<compile_context>
chip_gen: v7x
topology: tpu7x:2x2x1
jax: 0.10.0
libtpu: 0.0.40
codegen_flags: <defaults>
</compile_context>

<pallas_src>
import functools

import jax
import jax.numpy as jnp
from jax.experimental import pallas as pl
from jax.experimental.pallas import tpu as pltpu


# ----------------------------- Pallas kernel -------------------------------

def actor_forward_kernel(state_ref,
                         w_in_ref, b_in_ref,
                         w_hid_ref, b_hid_ref,
                         gamma_ref, beta_ref,
                         w_out_ref, b_out_ref,
                         out_ref,
                         *, num_layers: int, eps: float):
    """Actor forward for one batch tile; all weights VMEM-resident."""
    # ---- input layer + activation (tanh) ----
    x = jnp.dot(state_ref[...], w_in_ref[...],
                preferred_element_type=jnp.float32)
    x = jnp.tanh(x + b_in_ref[...])                               # (TB, H)

    # Hoist shared weights / LayerNorm params out of the unrolled layer loop.
    w_hid = w_hid_ref[...]                                        # (H, H)
    b_hid = b_hid_ref[...]                                        # (1, H)
    gamma = gamma_ref[...]                                        # (1, H)
    beta = beta_ref[...]                                          # (1, H)

    h = x.shape[-1]
    inv_hm1 = jnp.float32(1.0 / (h - 1))   # unbiased variance (torch .std())

    # num_layers x [ hid_layer -> LayerNorm -> tanh ]  (weights shared).
    # num_layers is small here; for large values switch to
    # lax.fori_loop(..., unroll=True) with the (TB, H) carry.
    for _ in range(num_layers):
        y = jnp.dot(x, w_hid, preferred_element_type=jnp.float32) + b_hid
        mean = jnp.mean(y, axis=-1, keepdims=True)
        centered = y - mean
        std = jnp.sqrt(jnp.sum(centered * centered, axis=-1, keepdims=True)
                       * inv_hm1)
        # EUP approximate reciprocal instead of a VPU divide.
        inv = pl.reciprocal(std + eps, approx=True)               # (TB, 1)
        x = jnp.tanh(centered * (gamma * inv) + beta)

    # ---- output layer + tanh (lane-dense padded output columns) ----
    o = jnp.dot(x, w_out_ref[...], preferred_element_type=jnp.float32)
    out_ref[...] = jnp.tanh(o + b_out_ref[...]).astype(out_ref.dtype)


# ------------------------------ wrapper ------------------------------------

def _round_up(x: int, m: int) -> int:
    return -(-x // m) * m


def actor_forward(state, params, *, num_layers: int, eps: float = 1e-6,
                  block_b: int = 128):
    """Run the Actor forward pass with a batch-tiled Pallas kernel.

    state:  (B, state_dim) float32
    params: dict with keys
        w_in  (state_dim, h), b_in  (1, h)
        w_hid (h, h),         b_hid (1, h)
        gamma (1, h),         beta  (1, h)
        w_out (h, action_dim), b_out (1, action_dim)
    """
    B, S = state.shape
    H = params["w_hid"].shape[0]
    A = params["w_out"].shape[1]

    # --- lane-dense output: pad action_dim to a multiple of 128 (zeros) ---
    A_pad = _round_up(A, 128)
    w_out = jnp.pad(params["w_out"], ((0, 0), (0, A_pad - A)))
    b_out = jnp.pad(params["b_out"], ((0, 0), (0, A_pad - A)))

    # --- batch tiling: pad B to a multiple of the batch block ---
    tb = block_b if B >= block_b else max(8, _round_up(B, 8))
    B_pad = _round_up(B, tb)
    state_p = jnp.pad(state, ((0, B_pad - B), (0, 0))) if B_pad != B else state
    grid = (B_pad // tb,)

    # Tiled-on-batch specs for state/out; weights use a constant index_map so
    # they stay resident in VMEM across every grid step.
    state_spec = pl.BlockSpec((tb, S), lambda i: (i, 0))
    out_spec = pl.BlockSpec((tb, A_pad), lambda i: (i, 0))

    def const_spec(arr):
        return pl.BlockSpec(arr.shape, lambda i: (0, 0))

    weight_args = (params["w_in"], params["b_in"],
                   params["w_hid"], params["b_hid"],
                   params["gamma"], params["beta"],
                   w_out, b_out)
    weight_specs = [const_spec(a) for a in weight_args]

    kernel = functools.partial(actor_forward_kernel,
                               num_layers=num_layers, eps=eps)

    flops = 2 * B_pad * (S * H + num_layers * H * H + H * A_pad)
    transcendentals = B_pad * (H * (num_layers + 1) + A_pad + 2 * num_layers)
    bytes_accessed = 4 * (B_pad * S + B_pad * A_pad
                          + sum(int(a.size) for a in weight_args))

    out = pl.pallas_call(
        kernel,
        out_shape=jax.ShapeDtypeStruct((B_pad, A_pad), jnp.float32),
        grid=grid,
        in_specs=[state_spec] + weight_specs,
        out_specs=out_spec,
        compiler_params=pltpu.CompilerParams(
            dimension_semantics=("parallel",)),
        cost_estimate=pl.CostEstimate(flops=flops,
                                      transcendentals=transcendentals,
                                      bytes_accessed=bytes_accessed),
    )(state_p, *weight_args)

    return out[:B, :A]


# --------------------------- reference (pure JAX) ---------------------------

def actor_forward_ref(state, params, *, num_layers: int, eps: float = 1e-6):
    x = jnp.tanh(state @ params["w_in"] + params["b_in"])
    h = x.shape[-1]
    for _ in range(num_layers):
        y = x @ params["w_hid"] + params["b_hid"]
        mean = jnp.mean(y, axis=-1, keepdims=True)
        c = y - mean
        std = jnp.sqrt(jnp.sum(c * c, axis=-1, keepdims=True) / (h - 1))
        y = params["gamma"] * c / (std + eps) + params["beta"]
        x = jnp.tanh(y)
    return jnp.tanh(x @ params["w_out"] + params["b_out"])


# --------------------------- deterministic init ------------------------------

def init_actor_params(key, state_dim, hidden, action_dim):
    """PyTorch-style Linear init: U(-1/sqrt(fan_in), 1/sqrt(fan_in))."""
    def linear(key, fan_in, fan_out):
        k = 1.0 / jnp.sqrt(jnp.float32(fan_in))
        kw, kb = jax.random.split(key)
        w = jax.random.uniform(kw, (fan_in, fan_out), jnp.float32, -k, k)
        b = jax.random.uniform(kb, (1, fan_out), jnp.float32, -k, k)
        return w, b

    k1, k2, k3 = jax.random.split(key, 3)
    w_in, b_in = linear(k1, state_dim, hidden)
    w_hid, b_hid = linear(k2, hidden, hidden)
    w_out, b_out = linear(k3, hidden, action_dim)
    return {
        "w_in": w_in, "b_in": b_in,
        "w_hid": w_hid, "b_hid": b_hid,
        "gamma": jnp.ones((1, hidden), jnp.float32),
        "beta": jnp.zeros((1, hidden), jnp.float32),
        "w_out": w_out, "b_out": b_out,
    }


# ----------------------------------- main -----------------------------------

if __name__ == "__main__":
    # Small shapes consistent with the Actor module.
    state_dim = 16
    hidden = 32        # args.hidden_size
    action_dim = 8     # args.action_dim
    num_layers = 2     # args.num_layers

    key = jax.random.PRNGKey(0)
    k_state, k_params, k_big = jax.random.split(key, 3)
    params = init_actor_params(k_params, state_dim, hidden, action_dim)

    # Tolerance loosened slightly vs f32 reference because the LayerNorm
    # divide uses the EUP approximate reciprocal (pl.reciprocal approx=True).
    tol = 5e-3

    # Single small batch (select_action / small rollout style).
    batch = 8
    state = jax.random.normal(k_state, (batch, state_dim), jnp.float32)
    out = jax.block_until_ready(actor_forward(state, params,
                                              num_layers=num_layers))
    ref = actor_forward_ref(state, params, num_layers=num_layers)
    assert out.shape == (batch, action_dim)
    assert jnp.allclose(out, ref, atol=tol, rtol=tol), "mismatch vs reference"

    # Larger batched evaluation: exercises the batch grid (2 blocks of 128).
    big_batch = 256
    state_big = jax.random.normal(k_big, (big_batch, state_dim), jnp.float32)
    out_big = jax.block_until_ready(actor_forward(state_big, params,
                                                  num_layers=num_layers))
    ref_big = actor_forward_ref(state_big, params, num_layers=num_layers)
    assert out_big.shape == (big_batch, action_dim)
    assert jnp.allclose(out_big, ref_big, atol=tol, rtol=tol), \
        "mismatch vs reference (batched)"

    print("KERNEL_OK")
</pallas_src>

<mosaic_0001>
module attributes {stable_mosaic.version = 11 : i64} {
  func.func @actor_forward_kernel(%arg0: i32, %arg1: memref<8x16xf32, #tpu.memory_space<vmem>>, %arg2: memref<16x32xf32, #tpu.memory_space<vmem>>, %arg3: memref<1x32xf32, #tpu.memory_space<vmem>>, %arg4: memref<32x32xf32, #tpu.memory_space<vmem>>, %arg5: memref<1x32xf32, #tpu.memory_space<vmem>>, %arg6: memref<1x32xf32, #tpu.memory_space<vmem>>, %arg7: memref<1x32xf32, #tpu.memory_space<vmem>>, %arg8: memref<32x128xf32, #tpu.memory_space<vmem>>, %arg9: memref<1x128xf32, #tpu.memory_space<vmem>>, %arg10: memref<8x128xf32, #tpu.memory_space<vmem>>) attributes {dimension_semantics = [#tpu.dimension_semantics<parallel>], iteration_bounds = array<i64: 1>, scalar_prefetch = 0 : i64, scratch_operands = 0 : i64, tpu.core_type = #tpu.core_type<tc>, window_params = [{transform_indices = @transform_0, window_bounds = array<i64: 8, 16>}, {pipeline_mode = #tpu.pipeline_mode<synchronous>, transform_indices = @transform_1, window_bounds = array<i64: 16, 32>}, {pipeline_mode = #tpu.pipeline_mode<synchronous>, transform_indices = @transform_2, window_bounds = array<i64: 1, 32>}, {pipeline_mode = #tpu.pipeline_mode<synchronous>, transform_indices = @transform_3, window_bounds = array<i64: 32, 32>}, {pipeline_mode = #tpu.pipeline_mode<synchronous>, transform_indices = @transform_4, window_bounds = array<i64: 1, 32>}, {pipeline_mode = #tpu.pipeline_mode<synchronous>, transform_indices = @transform_5, window_bounds = array<i64: 1, 32>}, {pipeline_mode = #tpu.pipeline_mode<synchronous>, transform_indices = @transform_6, window_bounds = array<i64: 1, 32>}, {pipeline_mode = #tpu.pipeline_mode<synchronous>, transform_indices = @transform_7, window_bounds = array<i64: 32, 128>}, {pipeline_mode = #tpu.pipeline_mode<synchronous>, transform_indices = @transform_8, window_bounds = array<i64: 1, 128>}, {transform_indices = @transform_9, window_bounds = array<i64: 8, 128>}]} {
    %c0 = arith.constant 0 : index
    %c0_0 = arith.constant 0 : index
    %0 = vector.load %arg1[%c0, %c0_0] : memref<8x16xf32, #tpu.memory_space<vmem>>, vector<8x16xf32>
    %c0_1 = arith.constant 0 : index
    %c0_2 = arith.constant 0 : index
    %1 = vector.load %arg2[%c0_1, %c0_2] : memref<16x32xf32, #tpu.memory_space<vmem>>, vector<16x32xf32>
    %cst = arith.constant dense<0.000000e+00> : vector<8x32xf32>
    %2 = tpu.matmul %0, %1, %cst {dimension_numbers = #tpu.dot_dimension_numbers<[1], [0], [0], [1], [0, 0, 1, 1], [], []>} : vector<8x16xf32>, vector<16x32xf32>, vector<8x32xf32> -> vector<8x32xf32>
    %c0_3 = arith.constant 0 : index
    %c0_4 = arith.constant 0 : index
    %3 = vector.load %arg3[%c0_3, %c0_4] : memref<1x32xf32, #tpu.memory_space<vmem>>, vector<1x32xf32>
    %4 = vector.broadcast %3 : vector<1x32xf32> to vector<8x32xf32>
    %5 = arith.addf %2, %4 : vector<8x32xf32>
    %6 = math.tanh %5 : vector<8x32xf32>
    %c0_5 = arith.constant 0 : index
    %c0_6 = arith.constant 0 : index
    %7 = vector.load %arg4[%c0_5, %c0_6] : memref<32x32xf32, #tpu.memory_space<vmem>>, vector<32x32xf32>
    %c0_7 = arith.constant 0 : index
    %c0_8 = arith.constant 0 : index
    %8 = vector.load %arg5[%c0_7, %c0_8] : memref<1x32xf32, #tpu.memory_space<vmem>>, vector<1x32xf32>
    %c0_9 = arith.constant 0 : index
    %c0_10 = arith.constant 0 : index
    %9 = vector.load %arg6[%c0_9, %c0_10] : memref<1x32xf32, #tpu.memory_space<vmem>>, vector<1x32xf32>
    %c0_11 = arith.constant 0 : index
    %c0_12 = arith.constant 0 : index
    %10 = vector.load %arg7[%c0_11, %c0_12] : memref<1x32xf32, #tpu.memory_space<vmem>>, vector<1x32xf32>
    %cst_13 = arith.constant dense<0.000000e+00> : vector<8x32xf32>
    %11 = tpu.matmul %6, %7, %cst_13 {dimension_numbers = #tpu.dot_dimension_numbers<[1], [0], [0], [1], [0, 0, 1, 1], [], []>} : vector<8x32xf32>, vector<32x32xf32>, vector<8x32xf32> -> vector<8x32xf32>
    %12 = vector.broadcast %8 : vector<1x32xf32> to vector<8x32xf32>
    %13 = arith.addf %11, %12 : vector<8x32xf32>
    %cst_14 = arith.constant dense<0.000000e+00> : vector<8xf32>
    %14 = vector.multi_reduction <add>, %13, %cst_14 [1] : vector<8x32xf32> to vector<8xf32>
    %15 = vector.shape_cast %14 : vector<8xf32> to vector<8x1xf32>
    %cst_15 = arith.constant 3.200000e+01 : f32
    %16 = vector.broadcast %cst_15 : f32 to vector<8x1xf32>
    %17 = arith.divf %15, %16 : vector<8x1xf32>
    %18 = vector.broadcast %17 : vector<8x1xf32> to vector<8x32xf32>
    %19 = arith.subf %13, %18 : vector<8x32xf32>
    %20 = arith.mulf %19, %19 : vector<8x32xf32>
    %cst_16 = arith.constant dense<0.000000e+00> : vector<8xf32>
    %21 = vector.multi_reduction <add>, %20, %cst_16 [1] : vector<8x32xf32> to vector<8xf32>
    %22 = vector.shape_cast %21 : vector<8xf32> to vector<8x1xf32>
    %cst_17 = arith.constant 0.0322580636 : f32
    %23 = vector.broadcast %cst_17 : f32 to vector<8x1xf32>
    %24 = arith.mulf %22, %23 : vector<8x1xf32>
    %25 = math.sqrt %24 : vector<8x1xf32>
    %cst_18 = arith.constant 9.99999997E-7 : f32
    %26 = vector.broadcast %cst_18 : f32 to vector<8x1xf32>
    %27 = arith.addf %25, %26 : vector<8x1xf32>
    %28 = tpu.reciprocal %27 {approx = true} : vector<8x1xf32> -> vector<8x1xf32>
    %29 = vector.broadcast %9 : vector<1x32xf32> to vector<8x32xf32>
    %30 = vector.broadcast %28 : vector<8x1xf32> to vector<8x32xf32>
    %31 = arith.mulf %29, %30 : vector<8x32xf32>
    %32 = arith.mulf %19, %31 : vector<8x32xf32>
    %33 = vector.broadcast %10 : vector<1x32xf32> to vector<8x32xf32>
    %34 = arith.addf %32, %33 : vector<8x32xf32>
    %35 = math.tanh %34 : vector<8x32xf32>
    %cst_19 = arith.constant dense<0.000000e+00> : vector<8x32xf32>
    %36 = tpu.matmul %35, %7, %cst_19 {dimension_numbers = #tpu.dot_dimension_numbers<[1], [0], [0], [1], [0, 0, 1, 1], [], []>} : vector<8x32xf32>, vector<32x32xf32>, vector<8x32xf32> -> vector<8x32xf32>
    %37 = vector.broadcast %8 : vector<1x32xf32> to vector<8x32xf32>
    %38 = arith.addf %36, %37 : vector<8x32xf32>
    %cst_20 = arith.constant dense<0.000000e+00> : vector<8xf32>
    %39 = vector.multi_reduction <add>, %38, %cst_20 [1] : vector<8x32xf32> to vector<8xf32>
    %40 = vector.shape_cast %39 : vector<8xf32> to vector<8x1xf32>
    %cst_21 = arith.constant 3.200000e+01 : f32
    %41 = vector.broadcast %cst_21 : f32 to vector<8x1xf32>
    %42 = arith.divf %40, %41 : vector<8x1xf32>
    %43 = vector.broadcast %42 : vector<8x1xf32> to vector<8x32xf32>
    %44 = arith.subf %38, %43 : vector<8x32xf32>
    %45 = arith.mulf %44, %44 : vector<8x32xf32>
    %cst_22 = arith.constant dense<0.000000e+00> : vector<8xf32>
    %46 = vector.multi_reduction <add>, %45, %cst_22 [1] : vector<8x32xf32> to vector<8xf32>
    %47 = vector.shape_cast %46 : vector<8xf32> to vector<8x1xf32>
    %cst_23 = arith.constant 0.0322580636 : f32
    %48 = vector.broadcast %cst_23 : f32 to vector<8x1xf32>
    %49 = arith.mulf %47, %48 : vector<8x1xf32>
    %50 = math.sqrt %49 : vector<8x1xf32>
    %cst_24 = arith.constant 9.99999997E-7 : f32
    %51 = vector.broadcast %cst_24 : f32 to vector<8x1xf32>
    %52 = arith.addf %50, %51 : vector<8x1xf32>
    %53 = tpu.reciprocal %52 {approx = true} : vector<8x1xf32> -> vector<8x1xf32>
    %54 = vector.broadcast %9 : vector<1x32xf32> to vector<8x32xf32>
    %55 = vector.broadcast %53 : vector<8x1xf32> to vector<8x32xf32>
    %56 = arith.mulf %54, %55 : vector<8x32xf32>
    %57 = arith.mulf %44, %56 : vector<8x32xf32>
    %58 = vector.broadcast %10 : vector<1x32xf32> to vector<8x32xf32>
    %59 = arith.addf %57, %58 : vector<8x32xf32>
    %60 = math.tanh %59 : vector<8x32xf32>
    %c0_25 = arith.constant 0 : index
    %c0_26 = arith.constant 0 : index
    %61 = vector.load %arg8[%c0_25, %c0_26] : memref<32x128xf32, #tpu.memory_space<vmem>>, vector<32x128xf32>
    %cst_27 = arith.constant dense<0.000000e+00> : vector<8x128xf32>
    %62 = tpu.matmul %60, %61, %cst_27 {dimension_numbers = #tpu.dot_dimension_numbers<[1], [0], [0], [1], [0, 0, 1, 1], [], []>} : vector<8x32xf32>, vector<32x128xf32>, vector<8x128xf32> -> vector<8x128xf32>
    %c0_28 = arith.constant 0 : index
    %c0_29 = arith.constant 0 : index
    %63 = vector.load %arg9[%c0_28, %c0_29] : memref<1x128xf32, #tpu.memory_space<vmem>>, vector<1x128xf32>
    %64 = vector.broadcast %63 : vector<1x128xf32> to vector<8x128xf32>
    %65 = arith.addf %62, %64 : vector<8x128xf32>
    %66 = math.tanh %65 : vector<8x128xf32>
    %c0_30 = arith.constant 0 : index
    %c0_31 = arith.constant 0 : index
    %67 = vector.load %arg10[%c0_30, %c0_31] : memref<8x128xf32, #tpu.memory_space<vmem>>, vector<8x128xf32>
    tpu.vector_store %arg10[%c0_30, %c0_31], %66 {strides = array<i32>} : memref<8x128xf32, #tpu.memory_space<vmem>>, vector<8x128xf32>,
    return
  }
  func.func @transform_0(%arg0: i32) -> (i32, i32) {
    %c0_i32 = arith.constant 0 : i32
    %c0_i32_0 = arith.constant 0 : i32
    return %arg0, %c0_i32 : i32, i32
  }
  func.func @transform_1(%arg0: i32) -> (i32, i32) {
    %c0_i32 = arith.constant 0 : i32
    %c0_i32_0 = arith.constant 0 : i32
    %c0_i32_1 = arith.constant 0 : i32
    return %c0_i32, %c0_i32_0 : i32, i32
  }
  func.func @transform_2(%arg0: i32) -> (i32, i32) {
    %c0_i32 = arith.constant 0 : i32
    %c0_i32_0 = arith.constant 0 : i32
    %c0_i32_1 = arith.constant 0 : i32
    return %c0_i32, %c0_i32_0 : i32, i32
  }
  func.func @transform_3(%arg0: i32) -> (i32, i32) {
    %c0_i32 = arith.constant 0 : i32
    %c0_i32_0 = arith.constant 0 : i32
    %c0_i32_1 = arith.constant 0 : i32
    return %c0_i32, %c0_i32_0 : i32, i32
  }
  func.func @transform_4(%arg0: i32) -> (i32, i32) {
    %c0_i32 = arith.constant 0 : i32
    %c0_i32_0 = arith.constant 0 : i32
    %c0_i32_1 = arith.constant 0 : i32
    return %c0_i32, %c0_i32_0 : i32, i32
  }
  func.func @transform_5(%arg0: i32) -> (i32, i32) {
    %c0_i32 = arith.constant 0 : i32
    %c0_i32_0 = arith.constant 0 : i32
    %c0_i32_1 = arith.constant 0 : i32
    return %c0_i32, %c0_i32_0 : i32, i32
  }
  func.func @transform_6(%arg0: i32) -> (i32, i32) {
    %c0_i32 = arith.constant 0 : i32
    %c0_i32_0 = arith.constant 0 : i32
    %c0_i32_1 = arith.constant 0 : i32
    return %c0_i32, %c0_i32_0 : i32, i32
  }
  func.func @transform_7(%arg0: i32) -> (i32, i32) {
    %c0_i32 = arith.constant 0 : i32
    %c0_i32_0 = arith.constant 0 : i32
    %c0_i32_1 = arith.constant 0 : i32
    return %c0_i32, %c0_i32_0 : i32, i32
  }
  func.func @transform_8(%arg0: i32) -> (i32, i32) {
    %c0_i32 = arith.constant 0 : i32
    %c0_i32_0 = arith.constant 0 : i32
    %c0_i32_1 = arith.constant 0 : i32
    return %c0_i32, %c0_i32_0 : i32, i32
  }
  func.func @transform_9(%arg0: i32) -> (i32, i32) {
    %c0_i32 = arith.constant 0 : i32
    %c0_i32_0 = arith.constant 0 : i32
    return %arg0, %c0_i32 : i32, i32
  }
}

</mosaic_0001>

<bundles_post_ra>
// kernel: tpu_custom_call.1
= control target key start
LH: loop header
LB: loop body
LE: loop exit
PB: predicated region body
PF: predicated region fallthrough
CT: control target
= control target key end

     0   :  { %14 = vsyncpa [#allocation3], 0  ;;  %s887_s0 = inlined_call_operand.hbm [shape: f32[8,16], index: 0, kind: input, shape index: {}]   ;;  %s888_s1 = inlined_call_operand.hbm [shape: f32[16,32], index: 1, kind: input, shape index: {}]   ;;  %s889_s2 = inlined_call_operand.vmem [shape: f32[1,32], index: 2, kind: input, shape index: {}]   ;;  %s890_s3 = inlined_call_operand.hbm [shape: f32[32,32], index: 3, kind: input, shape index: {}]   ;;  %s891_s4 = inlined_call_operand.vmem [shape: f32[1,32], index: 4, kind: input, shape index: {}]   ;;  %s892_s5 = inlined_call_operand.vmem [shape: f32[1,32], index: 5, kind: input, shape index: {}]   ;;  %s893_s6 = inlined_call_operand.vmem [shape: f32[1,32], index: 6, kind: input, shape index: {}]   ;;  %s894_s7 = inlined_call_operand.hbm [shape: f32[32,128], index: 7, kind: input, shape index: {}]   ;;  %s895_s8 = inlined_call_operand.vmem [shape: f32[1,128], index: 8, kind: input, shape index: {}]   ;;  %s896_s9 = inlined_call_operand.hbm [shape: f32[8,128], index: 9, kind: output, shape index: {}]  }
   0x1   :  { %15 = vsyncpa [#allocation6], 0 }
   0x2   :  { %16 = vsyncpa [#allocation9], 0 }
   0x3   :  { %17 = vsyncpa [#allocation4], 0  ;;  %s725_s30 = smov [#allocation5]   ;;  %s607_s13 = scalar_lea.hbm %s888_s1, 256 }
   0x4   :  { %s33_s10 = sshll.u32 %s725_s30, 4  ;;  %p608_p0 = scmp.ne.s32.totalorder %s888_s1, %s607_s13  ;;  %s34_s10 = int_to_ptr.vmem [resolvable:$true] %s33_s10 }
   0x5   :  { %p611_p1 = scmp.lt.u32.totalorder %s607_s13, %s888_s1 }
   0x7   :  { %p613_p2 = pnand %p611_p1, %p608_p0 }
   0x9   :  { %616 = shalt.err (!%p613_p2)
}
   0xa   :  { %s617_s18 = scalar_lea.vmem %s34_s10, 256  ;;  %p622_p4 = scmp.lt.s32.totalorder %s34_s10, %s34_s10 }
   0xb   :  { %p618_p3 = scmp.ne.s32.totalorder %s34_s10, %s617_s18  ;;  %p623_p5 = scmp.lt.s32.totalorder %s617_s18, %s617_s18 }
   0xd   :  { %p624_p6 = por %p623_p5, %p622_p4 }
   0xf   :  { %p625_p7 = pnand %p624_p6, %p618_p3 }
  0x11   :  { %628 = shalt.err (!%p625_p7)
}
  0x12   :  { %s726_s19 = smov 128   ;;  %s727_s20 = smov 8  }
  0x13   :  { %39 = dma.hbm_to_vmem [thread:$0]  %s888_s1, 256, %s34_s10, [#allocation6], %s726_s19, %s726_s19, %s727_s20  }
  0x14   :  { %s728_s23 = smov [#allocation2]   ;;  %s729_s25 = smov [#allocation7]  }
  0x15   :  { %s24_s24 = sshll.u32 %s728_s23, 4  ;;  %s47_s26 = sshll.u32 %s729_s25, 4  ;;  %s25_s24 = int_to_ptr.vmem [resolvable:$true] %s24_s24  ;;  %s48_s26 = int_to_ptr.vmem [resolvable:$true] %s47_s26 }
  0x16   :  { %s629_s29 = scalar_lea.hbm %s887_s0, 128 }
  0x17   :  { %p630_p8 = scmp.ne.s32.totalorder %s887_s0, %s629_s29  ;;  %p633_p9 = scmp.lt.u32.totalorder %s629_s29, %s887_s0 }
  0x19   :  { %p635_p10 = pnand %p633_p9, %p630_p8 }
  0x1b   :  { %638 = shalt.err (!%p635_p10)
}
  0x1c   :  { %s639_s1 = scalar_lea.vmem %s25_s24, 128  ;;  %p644_p12 = scmp.lt.s32.totalorder %s25_s24, %s25_s24 }
  0x1d   :  { %p640_p11 = scmp.ne.s32.totalorder %s25_s24, %s639_s1  ;;  %p645_p13 = scmp.lt.s32.totalorder %s639_s1, %s639_s1 }
  0x1f   :  { %p646_p0 = por %p645_p13, %p644_p12 }
  0x21   :  { %p647_p1 = pnand %p646_p0, %p640_p11 }
  0x23   :  { %650 = shalt.err (!%p647_p1)
}
  0x24   :  { %27 = dma.hbm_to_vmem [thread:$0]  %s887_s0, 128, %s25_s24, [#allocation3]  }
  0x25   :  { %s651_s17 = scalar_lea.hbm %s890_s3, 512 }
  0x26   :  { %p652_p2 = scmp.ne.s32.totalorder %s890_s3, %s651_s17  ;;  %p655_p3 = scmp.lt.u32.totalorder %s651_s17, %s890_s3 }
  0x28   :  { %p657_p4 = pnand %p655_p3, %p652_p2 }
  0x2a   :  { %660 = shalt.err (!%p657_p4)
}
  0x2b   :  { %s661_s25 = scalar_lea.vmem %s48_s26, 512  ;;  %p666_p6 = scmp.lt.s32.totalorder %s48_s26, %s48_s26 }
  0x2c   :  { %p662_p5 = scmp.ne.s32.totalorder %s48_s26, %s661_s25  ;;  %p667_p7 = scmp.lt.s32.totalorder %s661_s25, %s661_s25 }
  0x2e   :  { %p668_p8 = por %p667_p7, %p666_p6 }
  0x30   :  { %p669_p9 = pnand %p668_p8, %p662_p5 }
  0x32   :  { %672 = shalt.err (!%p669_p9)
}
  0x33   :  { %53 = dma.hbm_to_vmem [thread:$0]  %s890_s3, 512, %s48_s26, [#allocation6], %s726_s19, %s726_s19, %s727_s20  }
  0x34   :  { %s730_s27 = smov [#allocation8]   ;;  %s673_s11 = scalar_lea.hbm %s894_s7, 512 }
  0x35   :  { %s65_s28 = sshll.u32 %s730_s27, 4  ;;  %p674_p10 = scmp.ne.s32.totalorder %s894_s7, %s673_s11  ;;  %s66_s28 = int_to_ptr.vmem [resolvable:$true] %s65_s28 }
  0x36   :  { %p677_p11 = scmp.lt.u32.totalorder %s673_s11, %s894_s7 }
  0x38   :  { %p679_p12 = pnand %p677_p11, %p674_p10 }
  0x3a   :  { %682 = shalt.err (!%p679_p12)
}
  0x3b   :  { %s683_s14 = scalar_lea.vmem %s66_s28, 512  ;;  %p688_p0 = scmp.lt.s32.totalorder %s66_s28, %s66_s28 }
  0x3c   :  { %p684_p13 = scmp.ne.s32.totalorder %s66_s28, %s683_s14  ;;  %p689_p1 = scmp.lt.s32.totalorder %s683_s14, %s683_s14 }
  0x3e   :  { %p690_p2 = por %p689_p1, %p688_p0 }
  0x40   :  { %p691_p3 = pnand %p690_p2, %p684_p13 }
  0x42   :  { %694 = shalt.err (!%p691_p3)
}
  0x43   :  { %71 = dma.hbm_to_vmem [thread:$0]  %s894_s7, 512, %s66_s28, [#allocation9], %s726_s19, %s726_s19, %s727_s20  }
  0x44   :  { %717 = dma.done.wait [#allocation3], 128  }
  0x45   :  { %718 = vsyncadd [#allocation3], 4294967168 }
  0x46   :  { %719 = dma.done.wait [#allocation6], 768  }
  0x47   :  { %720 = vsyncadd [#allocation6], 4294966528 }
  0x48   :  { %721 = dma.done.wait [#allocation9], 512  }
  0x49   :  { %722 = vsyncadd [#allocation9], 4294966784  ;;  %v731_v0 = vmov 0.0|0.0   ;;  %vm732_vm0 = vmmov 0   ;;  %v733_v1 = vmov 0.0   ;;  %v87_v2 = vld [vmem:[#allocation5] sm:$0xff] }
  0x4a   :  { %560 = vmatprep.subr.bf16.mxu0 %v731_v0  ;;  %524 = vmatprep.mubr.msk.f32.mxu0 %vm732_vm0, %v733_v1  ;;  %v88_v3 = vld [vmem:[#allocation5 + $0x8] sm:$0xff]  ;;  %v86_v5 = vld [vmem:[#allocation2] sm:$0xff]  ;;  %vm96_vm1 = vcmask 130048   ;;  %v171_v6 = vld [vmem:[#allocation7] sm:$0xff]  ;;  %vm184_vm2 = vcmask 261120   ;;  %s734_s18 = smov [#allocation10]  }
  0x4b   :  { %563 = vmatprep.subr.bf16.mxu1 %v731_v0  ;;  %535 = vmatprep.mubr.msk.f32.mxu1 %vm732_vm0, %v733_v1  ;;  %v561_v4 = vpack.c.bf16 %v88_v3, %v87_v2  ;;  %v172_v7 = vld [vmem:[#allocation7 + $0x8] sm:$0xff]  ;;  %v173_v8 = vld [vmem:[#allocation7 + $0x10] sm:$0xff]  ;;  %v174_v10 = vld [vmem:[#allocation7 + $0x18] sm:$0xff]  ;;  %s482_s21 = sshll.u32 %s734_s18, 4  ;;  %s483_s21 = int_to_ptr.vmem [resolvable:$true] %s482_s21 }
  0x4c   :  { %v564_v9 = vpack.c.bf16 %v172_v7, %v171_v6  ;;  %v567_v11 = vpack.c.bf16 %v174_v10, %v173_v8  ;;  %v493_v12 = vld [vmem:[%s889_s2] ss:$0 sm:$0xff]  ;;  %v390_v51 = vld [vmem:[#allocation8] sm:$0xff]  ;;  %v392_v53 = vld [vmem:[#allocation8 + $0x10] sm:$0xff]  ;;  %s695_s22 = scalar_lea.vmem %s483_s21, 128  ;;  %p700_p5 = scmp.lt.s32.totalorder %s483_s21, %s483_s21 }
  0x4d   :  { %562 = vmatpush3.bf16.msra.mxu0 %v561_v4  ;;  %v495_v17 = vld [vmem:[%s891_s4] ss:$0 sm:$0xff]  ;;  %v393_v55 = vld [vmem:[#allocation8 + $0x18] sm:$0xff]  ;;  %p696_p4 = scmp.ne.s32.totalorder %s483_s21, %s695_s22  ;;  %p701_p6 = scmp.lt.s32.totalorder %s695_s22, %s695_s22 }
  0x4e   :  { %569 = vmatprep.subr.bf16.mxu0 %v731_v0  ;;  %565 = vmatpush3.bf16.msra.mxu1 %v564_v9  ;;  %v497_v35 = vld [vmem:[%s892_s5] ss:$0 sm:$0xff]  ;;  %v579_v56 = vpack.c.bf16 %v393_v55, %v392_v53 }
  0x4f   :  { %566 = vmatprep.subr.bf16.mxu1 %v731_v0  ;;  %v498_v38 = vld [vmem:[%s893_s6] ss:$0 sm:$0xff]  ;;  %p702_p7 = por %p701_p6, %p700_p5 }
  0x50   :  { %525 = vmatmul.mubr.msk.f32.vlgmr.msra.gmra.mrb[0].mxu0 %vm96_vm1, %v86_v5  ;;  %v391_v52 = vld [vmem:[#allocation8 + $0x8] sm:$0xff] }
  0x51   :  { %546 = vmatprep.mubr.msk.f32.mxu0 %vm732_vm0, %v733_v1  ;;  %571 = vmatpush3.bf16.msra.mxu0 %v564_v9  ;;  %v576_v54 = vpack.c.bf16 %v391_v52, %v390_v51  ;;  %p703_p8 = pnand %p702_p7, %p696_p4 }
  0x52   :  { %572 = vmatprep.subr.bf16.mxu0 %v731_v0  ;;  %568 = vmatpush3.bf16.msra.mxu1 %v567_v11 }
  0x53   :  { %575 = vmatprep.subr.bf16.mxu1 %v731_v0 }
  0x55   :  { %574 = vmatpush3.bf16.msra.mxu0 %v567_v11 }
 0x123   :  { %v166_v13 = vpop.f32.mrb[0].mxu0 }
 0x124   :  { %v167_v14 = vadd.f32 %v493_v12, %v166_v13  ;;  %v526_v15 = vpop.f32.mrb[1].mxu0 }
 0x126   :  { %591 = vtanh.f32 %v167_v14 }
 0x130   :  { %v592_v16 = vpop.eup %591 }
 0x131   :  { %536 = vmatmul.mubr.msk.f32.vlgmr.msra.gmra.mrb[0].mxu1 %vm184_vm2, %v592_v16 }
 0x132   :  { %557 = vmatprep.mubr.msk.f32.mxu1 %vm732_vm0, %v733_v1  ;;  %577 = vmatpush3.bf16.msra.mxu1 %v576_v54 }
 0x133   :  { %578 = vmatprep.subr.bf16.mxu1 %v731_v0  ;;  %v500_v0 = vld [vmem:[%s895_s8] ss:$0 sm:$0xff] }
 0x136   :  { %580 = vmatpush3.bf16.msra.mxu1 %v579_v56 }
 0x204   :  { %v254_v18 = vpop.f32.mrb[0].mxu1 }
 0x205   :  { %v255_v19 = vadd.f32 %v495_v17, %v254_v18  ;;  %v537_v20 = vpop.f32.mrb[1].mxu1 }
 0x207   :  { %v258_v21 = vsel %vm184_vm2, %v255_v19, 0.0 }
 0x208   :  { %259 = vadd.xlane.f32.xlu0 %v258_v21 }
 0x295   :  { %v260_v22 = vpop.xlane.xlu0 %259 }
 0x296   :  { %v262_v23 = vmul.f32 0.03125, %v260_v22 }
 0x298   :  { %v263_v24 = vsub.f32 %v255_v19, %v262_v23 }
 0x29a   :  { %v264_v25 = vmul.f32 %v263_v24, %v263_v24 }
 0x29c   :  { %v265_v26 = vsel %vm184_vm2, %v264_v25, 0.0 }
 0x29d   :  { %266 = vadd.xlane.f32.xlu0 %v265_v26 }
 0x32a   :  { %v267_v27 = vpop.xlane.xlu0 %266 }
 0x32b   :  { %v268_v28 = vmul.f32 0.032258064, %v267_v27 }
 0x32d   :  { %593 = vrsqrt.f32 %v268_v28  ;;  %vm271_vm3 = vcmp.eq.f32.partialorder %v268_v28, inf  ;;  %v274_v31 = vand.u32 2147483648, %v268_v28  ;;  %vm273_vm4 = vcmp.eq.f32.partialorder %v268_v28, 0.0 }
 0x337   :  { %v594_v29 = vpop.eup %593 }
 0x338   :  { %v270_v30 = vmul.f32 %v594_v29, %v268_v28 }
 0x33a   :  { %v272_v32 = vsel %vm271_vm3, %v268_v28, %v270_v30 }
 0x33b   :  { %v275_v33 = vsel %vm273_vm4, %v274_v31, %v272_v32 }
 0x33c   :  { %v276_v34 = vadd.f32 1e-06, %v275_v33 }
 0x33e   :  { %595 = vrcp.f32 %v276_v34 }
 0x348   :  { %v596_v36 = vpop.eup %595 }
 0x349   :  { %v284_v37 = vmul.f32 %v596_v36, %v497_v35 }
 0x34b   :  { %v285_v39 = vmul.f32 %v284_v37, %v263_v24 }
 0x34d   :  { %v292_v40 = vadd.f32 %v498_v38, %v285_v39 }
 0x34f   :  { %597 = vtanh.f32 %v292_v40 }
 0x359   :  { %v598_v41 = vpop.eup %597 }
 0x35a   :  { %547 = vmatmul.mubr.msk.f32.vlgmr.msra.gmra.mrb[2].mxu0 %vm184_vm2, %v598_v41 }
 0x42d   :  { %v363_v42 = vpop.f32.mrb[2].mxu0 }
 0x42e   :  { %v364_v43 = vadd.f32 %v495_v17, %v363_v42  ;;  %v548_v44 = vpop.f32.mrb[3].mxu0 }
 0x430   :  { %v367_v45 = vsel %vm184_vm2, %v364_v43, 0.0 }
 0x431   :  { %368 = vadd.xlane.f32.xlu1 %v367_v45 }
 0x4be   :  { %v369_v46 = vpop.xlane.xlu1 %368 }
 0x4bf   :  { %v370_v47 = vmul.f32 0.03125, %v369_v46 }
 0x4c1   :  { %v371_v48 = vsub.f32 %v364_v43, %v370_v47 }
 0x4c3   :  { %v372_v49 = vmul.f32 %v371_v48, %v371_v48 }
 0x4c5   :  { %v373_v50 = vsel %vm184_vm2, %v372_v49, 0.0 }
 0x4c6   :  { %374 = vadd.xlane.f32.xlu1 %v373_v50 }
 0x553   :  { %v375_v57 = vpop.xlane.xlu1 %374 }
 0x554   :  { %v376_v58 = vmul.f32 0.032258064, %v375_v57 }
 0x556   :  { %599 = vrsqrt.f32 %v376_v58  ;;  %vm379_vm5 = vcmp.eq.f32.partialorder %v376_v58, inf  ;;  %v382_v61 = vand.u32 2147483648, %v376_v58  ;;  %vm381_vm6 = vcmp.eq.f32.partialorder %v376_v58, 0.0 }
 0x560   :  { %v600_v59 = vpop.eup %599 }
 0x561   :  { %v378_v60 = vmul.f32 %v600_v59, %v376_v58 }
 0x563   :  { %v380_v62 = vsel %vm379_vm5, %v376_v58, %v378_v60 }
 0x564   :  { %v383_v63 = vsel %vm381_vm6, %v382_v61, %v380_v62 }
 0x565   :  { %v384_v1 = vadd.f32 1e-06, %v383_v63 }
 0x567   :  { %601 = vrcp.f32 %v384_v1 }
 0x571   :  { %v602_v2 = vpop.eup %601 }
 0x572   :  { %v386_v3 = vmul.f32 %v602_v2, %v497_v35 }
 0x574   :  { %v387_v4 = vmul.f32 %v386_v3, %v371_v48 }
 0x576   :  { %v388_v5 = vadd.f32 %v498_v38, %v387_v4 }
 0x578   :  { %603 = vtanh.f32 %v388_v5 }
 0x582   :  { %v604_v6 = vpop.eup %603 }
 0x583   :  { %558 = vmatmul.mubr.msk.f32.vlgmr.msra.gmra.mrb[2].mxu1 %vm184_vm2, %v604_v6 }
 0x656   :  { %v470_v7 = vpop.f32.mrb[2].mxu1 }
 0x657   :  { %v471_v8 = vadd.f32 %v500_v0, %v470_v7  ;;  %v559_v9 = vpop.f32.mrb[3].mxu1 }
 0x659   :  { %605 = vtanh.f32 %v471_v8 }
 0x663   :  { %v606_v10 = vpop.eup %605 }
 0x664   :  { %475 = vst [vmem:[#allocation10] sm:$0xff] %v606_v10 }
 0x665   :  { %706 = shalt.err (!%p703_p8)
}
 0x666   :  { %s707_s8 = scalar_lea.hbm %s896_s9, 128 }
 0x667   :  { %p708_p9 = scmp.ne.s32.totalorder %s896_s9, %s707_s8  ;;  %p711_p10 = scmp.lt.u32.totalorder %s707_s8, %s896_s9 }
 0x669   :  { %p713_p11 = pnand %p711_p10, %p708_p9 }
 0x66b   :  { %716 = shalt.err (!%p713_p11)
}
 0x66c   :  { %485 = dma.vmem_to_hbm [thread:$0]  %s483_s21, 128, %s896_s9, [#allocation4]  }
 0x66d   :  { %723 = dma.done.wait [#allocation4], 128  }
 0x66e   :  { %724 = vsyncadd [#allocation4], 4294967168 }
 0x66f   :  { %489 = vsyncpa [#allocation3], 1 }
 0x670   :  { %490 = vsyncpa [#allocation6], 1 }
 0x671   :  { %491 = vsyncpa [#allocation9], 1 }
 0x672   :  { %492 = vsyncpa [#allocation4], 1 }

</bundles_post_ra>
